<compile_context>
chip_gen: v7x
topology: tpu7x:2x2x1
jax: 0.10.0
libtpu: 0.0.40
codegen_flags: <defaults>
</compile_context>

<pallas_src>
import jax
import jax.numpy as jnp
from jax.experimental import pallas as pl
from jax.experimental.pallas import tpu as pltpu

HIDDEN_SIZE = 128


# ---------------------------------------------------------------------------
# Kernel
# ---------------------------------------------------------------------------
def _critic_kernel(
    obs_ref,                 # [TB, obs_dim]  f32
    w_in_ref,                # [obs_dim, 128] bf16 (block-diagonal fused input)
    w1_ref,                  # [128, 128]     bf16
    w2_ref,                  # [128, 128]     bf16
    w3_ref,                  # [1, 128]       f32 (head row, VPU path)
    b_ref,                   # [4, 128]       f32 (rows: b_in, b1, b2, [b3,0..])
    out_ref,                 # [TB, 1]        f32
):
    f32 = jnp.float32

    b_in = b_ref[0:1, :]
    b1 = b_ref[1:2, :]
    b2 = b_ref[2:3, :]
    b3 = b_ref[3:4, 0:1]     # [1,1] broadcast against [TB,1]

    # Fused input blocks: one block-diagonal matmul replaces the two
    # robot/anchor Linear+ReLU layers (the concat is folded away).
    x = obs_ref[...].astype(w_in_ref.dtype)
    h = jnp.maximum(
        jnp.dot(x, w_in_ref[...], preferred_element_type=f32) + b_in, 0.0
    )

    # value[0]: Linear(128 -> 128) + ReLU.
    h = jnp.maximum(
        jnp.dot(h.astype(w1_ref.dtype), w1_ref[...], preferred_element_type=f32)
        + b1,
        0.0,
    )

    # value[2]: Linear(128 -> 128) + ReLU.
    h = jnp.maximum(
        jnp.dot(h.astype(w2_ref.dtype), w2_ref[...], preferred_element_type=f32)
        + b2,
        0.0,
    )

    # value[4]: Linear(128 -> 1) as VPU multiply + XLU lane reduction
    # (an N=1 MXU matmul would cost a full vmatmul cadence for 1/128 work).
    out_ref[...] = (
        jnp.sum(h * w3_ref[...], axis=-1, keepdims=True) + b3
    ).astype(out_ref.dtype)
    # NOTE: [tb,1] last-dim stores are masked vst; the lane-dense alternative
    # needs a sublane->lane relayout of the reduce result -- measure-both item,
    # write volume here is negligible vs. obs reads.


# ---------------------------------------------------------------------------
# Wrapper
# ---------------------------------------------------------------------------
def _round_up(x, m):
    return (x + m - 1) // m * m


def prepare_params(params, obs_dim, *, matmul_dtype=jnp.bfloat16):
    """Fuse the PyTorch-layout params into kernel-ready tensors (done once).

    Builds the block-diagonal input weight, packs all biases into one
    resident [4, 128] f32 block, keeps the head row in f32 (VPU path), and
    casts the MXU weight operands to `matmul_dtype` (bf16 by default; pass
    jnp.float32 for an all-f32 kernel).
    """
    w_r, b_r, w_a, b_a, w1, b1, w2, b2, w3, b3 = params
    half = HIDDEN_SIZE // 2
    n_robot = obs_dim - 3

    w_in = jnp.zeros((obs_dim, HIDDEN_SIZE), jnp.float32)
    w_in = w_in.at[:n_robot, :half].set(w_r)
    w_in = w_in.at[n_robot:, half:].set(w_a)
    b_in = jnp.concatenate([b_r, b_a])

    biases = jnp.zeros((4, HIDDEN_SIZE), jnp.float32)
    biases = biases.at[0].set(b_in)
    biases = biases.at[1].set(b1)
    biases = biases.at[2].set(b2)
    biases = biases.at[3, 0].set(b3[0])

    return (
        w_in.astype(matmul_dtype),
        w1.astype(matmul_dtype),
        w2.astype(matmul_dtype),
        w3.reshape(1, HIDDEN_SIZE).astype(jnp.float32),  # head row (VPU+XLU)
        biases,
    )


def critic_forward(obs, fused_params, *, block_b=4096, use_core_parallel=False):
    """obs: [B, obs_dim] f32. Returns state value [B, 1] f32.

    block_b: batch rows per grid step (default 4096 ~ 16-18 MiB of VMEM
             buffers; capped at 8192 for the v7x 64 MiB VMEM ceiling).
    use_core_parallel: opt-in pltpu.CORE_PARALLEL on the batch axis for
             guaranteed dual-TC execution on v7x (verify in the trace);
             default keeps plain "parallel" (safe on single-TC v5e/v6e).
    """
    B, obs_dim = obs.shape

    # Batch tile: multiple of 8 sublanes, capped at block_b rows (and at 8192
    # so the footprint stays under the v7x VMEM ceiling).
    tb = min(block_b, 8192, _round_up(B, 8))
    b_pad = _round_up(B, tb)
    if b_pad != B:
        obs = jnp.pad(obs, ((0, b_pad - B), (0, 0)))

    grid = (b_pad // tb,)

    in_specs = [pl.BlockSpec((tb, obs_dim), lambda i: (i, 0))]
    # Weights / biases: full-array blocks, constant index_map -> VMEM resident.
    in_specs += [pl.BlockSpec(p.shape, lambda i: (0, 0)) for p in fused_params]

    # Explicit scoped-VMEM budget: ~4 KiB per batch row (lane-padded obs/out
    # double buffers + f32/bf16 hidden temps) + resident weights + margin.
    # Needed so large tiles work on v5e (16 MiB default scoped limit) while
    # staying under the v7x usable ceiling (~48 MiB of 64 MiB physical).
    vmem_limit = int(tb * 4096 + (6 << 20))
    vmem_limit = max(16 << 20, min(vmem_limit, 48 << 20))

    dim_sem = (pltpu.CORE_PARALLEL,) if use_core_parallel else ("parallel",)

    out = pl.pallas_call(
        _critic_kernel,
        out_shape=jax.ShapeDtypeStruct((b_pad, 1), jnp.float32),
        grid=grid,
        in_specs=in_specs,
        out_specs=pl.BlockSpec((tb, 1), lambda i: (i, 0)),
        compiler_params=pltpu.CompilerParams(
            dimension_semantics=dim_sem,
            vmem_limit_bytes=vmem_limit,
        ),
    )(obs, *fused_params)

    return out[:B] if b_pad != B else out


# ---------------------------------------------------------------------------
# Param init + references
# ---------------------------------------------------------------------------
def init_params(key, obs_dim):
    """Deterministic parameter init (uniform, Kaiming-ish scale), PyTorch layout
    transposed to [in_features, out_features]."""
    half = HIDDEN_SIZE // 2
    keys = jax.random.split(key, 10)

    def lin(kw, kb, fan_in, fan_out):
        bound = 1.0 / jnp.sqrt(fan_in)
        w = jax.random.uniform(kw, (fan_in, fan_out), jnp.float32, -bound, bound)
        b = jax.random.uniform(kb, (fan_out,), jnp.float32, -bound, bound)
        return w, b

    w_r, b_r = lin(keys[0], keys[1], obs_dim - 3, half)
    w_a, b_a = lin(keys[2], keys[3], 3, half)
    w1, b1 = lin(keys[4], keys[5], HIDDEN_SIZE, HIDDEN_SIZE)
    w2, b2 = lin(keys[6], keys[7], HIDDEN_SIZE, HIDDEN_SIZE)
    w3, b3 = lin(keys[8], keys[9], HIDDEN_SIZE, 1)
    return (w_r, b_r, w_a, b_a, w1, b1, w2, b2, w3, b3)


def critic_ref(obs, params):
    """Pure-JAX f32 reference mirroring the PyTorch forward exactly."""
    (w_r, b_r, w_a, b_a, w1, b1, w2, b2, w3, b3) = params
    out_robot = jax.nn.relu(obs[:, :-3] @ w_r + b_r)
    out_anchor = jax.nn.relu(obs[:, -3:] @ w_a + b_a)
    h = jnp.concatenate([out_robot, out_anchor], axis=1)
    h = jax.nn.relu(h @ w1 + b1)
    h = jax.nn.relu(h @ w2 + b2)
    return h @ w3 + b3


def critic_ref_fused(obs, fused_params):
    """Pure-JAX reference with the SAME fused layout and bf16 operand casts
    as the kernel (tight numerical match)."""
    w_in, w1, w2, w3_row, biases = fused_params
    f32 = jnp.float32
    b_in, b1, b2 = biases[0:1], biases[1:2], biases[2:3]
    b3 = biases[3, 0]
    x = obs.astype(w_in.dtype)
    h = jax.nn.relu(jnp.dot(x, w_in, preferred_element_type=f32) + b_in)
    h = jax.nn.relu(jnp.dot(h.astype(w1.dtype), w1, preferred_element_type=f32) + b1)
    h = jax.nn.relu(jnp.dot(h.astype(w2.dtype), w2, preferred_element_type=f32) + b2)
    return jnp.sum(h * w3_row, axis=-1, keepdims=True) + b3


# ---------------------------------------------------------------------------
# Self-test
# ---------------------------------------------------------------------------
if __name__ == "__main__":
    key = jax.random.PRNGKey(0)
    k_obs, k_params, k_obs2 = jax.random.split(key, 3)

    OBS_DIM = 19  # obs_dim - 3 = 16 robot features, last 3 = next anchor
    params = init_params(k_params, OBS_DIM)
    fused = prepare_params(params, OBS_DIM)  # bf16 matmuls, f32 elsewhere

    # ---- Small batch (single tile) -----------------------------------------
    B = 8
    obs = jax.random.normal(k_obs, (B, OBS_DIM), dtype=jnp.float32)
    value = jax.block_until_ready(critic_forward(obs, fused))
    assert value.shape == (B, 1)

    # Tight check against a pure-JAX reference with identical bf16 casts.
    expected_matched = critic_ref_fused(obs, fused)
    assert jnp.allclose(value, expected_matched, atol=2e-3, rtol=2e-3), (
        float(jnp.max(jnp.abs(value - expected_matched)))
    )

    # Sanity check against the full-f32 PyTorch-semantics reference
    # (loose tolerance accounts for bf16 operands, f32 accumulation).
    expected_f32 = critic_ref(obs, params)
    assert float(jnp.max(jnp.abs(value - expected_f32))) < 1e-1

    # ---- Multi-tile grid + batch-padding path ------------------------------
    B2 = 300  # not a multiple of the tile -> exercises padding + out[:B] slice
    obs2 = jax.random.normal(k_obs2, (B2, OBS_DIM), dtype=jnp.float32)
    value2 = jax.block_until_ready(critic_forward(obs2, fused, block_b=128))
    assert value2.shape == (B2, 1)
    expected2 = critic_ref_fused(obs2, fused)
    assert jnp.allclose(value2, expected2, atol=2e-3, rtol=2e-3), (
        float(jnp.max(jnp.abs(value2 - expected2)))
    )

    print("KERNEL_OK")
</pallas_src>

<mosaic_0001>
module attributes {stable_mosaic.version = 11 : i64} {
  func.func @_critic_kernel(%arg0: i32, %arg1: memref<8x19xf32, #tpu.memory_space<vmem>>, %arg2: memref<19x128xbf16, #tpu.memory_space<vmem>>, %arg3: memref<128x128xbf16, #tpu.memory_space<vmem>>, %arg4: memref<128x128xbf16, #tpu.memory_space<vmem>>, %arg5: memref<1x128xf32, #tpu.memory_space<vmem>>, %arg6: memref<4x128xf32, #tpu.memory_space<vmem>>, %arg7: memref<8x1xf32, #tpu.memory_space<vmem>>) attributes {dimension_semantics = [#tpu.dimension_semantics<parallel>], iteration_bounds = array<i64: 1>, scalar_prefetch = 0 : i64, scratch_operands = 0 : i64, tpu.core_type = #tpu.core_type<tc>, window_params = [{transform_indices = @transform_0, window_bounds = array<i64: 8, 19>}, {pipeline_mode = #tpu.pipeline_mode<synchronous>, transform_indices = @transform_1, window_bounds = array<i64: 19, 128>}, {pipeline_mode = #tpu.pipeline_mode<synchronous>, transform_indices = @transform_2, window_bounds = array<i64: 128, 128>}, {pipeline_mode = #tpu.pipeline_mode<synchronous>, transform_indices = @transform_3, window_bounds = array<i64: 128, 128>}, {pipeline_mode = #tpu.pipeline_mode<synchronous>, transform_indices = @transform_4, window_bounds = array<i64: 1, 128>}, {pipeline_mode = #tpu.pipeline_mode<synchronous>, transform_indices = @transform_5, window_bounds = array<i64: 4, 128>}, {transform_indices = @transform_6, window_bounds = array<i64: 8, 1>}]} {
    %c0 = arith.constant 0 : index
    %c0_0 = arith.constant 0 : index
    %0 = vector.load %arg6[%c0, %c0_0] : memref<4x128xf32, #tpu.memory_space<vmem>>, vector<1x128xf32>
    %c1 = arith.constant 1 : index
    %c0_1 = arith.constant 0 : index
    %1 = vector.load %arg6[%c1, %c0_1] : memref<4x128xf32, #tpu.memory_space<vmem>>, vector<1x128xf32>
    %c2 = arith.constant 2 : index
    %c0_2 = arith.constant 0 : index
    %2 = vector.load %arg6[%c2, %c0_2] : memref<4x128xf32, #tpu.memory_space<vmem>>, vector<1x128xf32>
    %c3 = arith.constant 3 : index
    %c0_3 = arith.constant 0 : index
    %3 = vector.load %arg6[%c3, %c0_3] : memref<4x128xf32, #tpu.memory_space<vmem>>, vector<1x1xf32>
    %c0_4 = arith.constant 0 : index
    %c0_5 = arith.constant 0 : index
    %4 = vector.load %arg1[%c0_4, %c0_5] : memref<8x19xf32, #tpu.memory_space<vmem>>, vector<8x19xf32>
    %5 = arith.truncf %4 : vector<8x19xf32> to vector<8x19xbf16>
    %c0_6 = arith.constant 0 : index
    %c0_7 = arith.constant 0 : index
    %6 = vector.load %arg2[%c0_6, %c0_7] : memref<19x128xbf16, #tpu.memory_space<vmem>>, vector<19x128xbf16>
    %cst = arith.constant dense<0.000000e+00> : vector<8x128xf32>
    %7 = tpu.matmul %5, %6, %cst {dimension_numbers = #tpu.dot_dimension_numbers<[1], [0], [0], [1], [0, 0, 1, 1], [], []>} : vector<8x19xbf16>, vector<19x128xbf16>, vector<8x128xf32> -> vector<8x128xf32>
    %8 = vector.broadcast %0 : vector<1x128xf32> to vector<8x128xf32>
    %9 = arith.addf %7, %8 : vector<8x128xf32>
    %cst_8 = arith.constant 0.000000e+00 : f32
    %10 = vector.broadcast %cst_8 : f32 to vector<8x128xf32>
    %11 = arith.maximumf %9, %10 : vector<8x128xf32>
    %12 = arith.truncf %11 : vector<8x128xf32> to vector<8x128xbf16>
    %c0_9 = arith.constant 0 : index
    %c0_10 = arith.constant 0 : index
    %13 = vector.load %arg3[%c0_9, %c0_10] : memref<128x128xbf16, #tpu.memory_space<vmem>>, vector<128x128xbf16>
    %cst_11 = arith.constant dense<0.000000e+00> : vector<8x128xf32>
    %14 = tpu.matmul %12, %13, %cst_11 {dimension_numbers = #tpu.dot_dimension_numbers<[1], [0], [0], [1], [0, 0, 1, 1], [], []>} : vector<8x128xbf16>, vector<128x128xbf16>, vector<8x128xf32> -> vector<8x128xf32>
    %15 = vector.broadcast %1 : vector<1x128xf32> to vector<8x128xf32>
    %16 = arith.addf %14, %15 : vector<8x128xf32>
    %cst_12 = arith.constant 0.000000e+00 : f32
    %17 = vector.broadcast %cst_12 : f32 to vector<8x128xf32>
    %18 = arith.maximumf %16, %17 : vector<8x128xf32>
    %19 = arith.truncf %18 : vector<8x128xf32> to vector<8x128xbf16>
    %c0_13 = arith.constant 0 : index
    %c0_14 = arith.constant 0 : index
    %20 = vector.load %arg4[%c0_13, %c0_14] : memref<128x128xbf16, #tpu.memory_space<vmem>>, vector<128x128xbf16>
    %cst_15 = arith.constant dense<0.000000e+00> : vector<8x128xf32>
    %21 = tpu.matmul %19, %20, %cst_15 {dimension_numbers = #tpu.dot_dimension_numbers<[1], [0], [0], [1], [0, 0, 1, 1], [], []>} : vector<8x128xbf16>, vector<128x128xbf16>, vector<8x128xf32> -> vector<8x128xf32>
    %22 = vector.broadcast %2 : vector<1x128xf32> to vector<8x128xf32>
    %23 = arith.addf %21, %22 : vector<8x128xf32>
    %cst_16 = arith.constant 0.000000e+00 : f32
    %24 = vector.broadcast %cst_16 : f32 to vector<8x128xf32>
    %25 = arith.maximumf %23, %24 : vector<8x128xf32>
    %c0_17 = arith.constant 0 : index
    %c0_18 = arith.constant 0 : index
    %26 = vector.load %arg5[%c0_17, %c0_18] : memref<1x128xf32, #tpu.memory_space<vmem>>, vector<1x128xf32>
    %27 = vector.broadcast %26 : vector<1x128xf32> to vector<8x128xf32>
    %28 = arith.mulf %25, %27 : vector<8x128xf32>
    %cst_19 = arith.constant dense<0.000000e+00> : vector<8xf32>
    %29 = vector.multi_reduction <add>, %28, %cst_19 [1] : vector<8x128xf32> to vector<8xf32>
    %30 = vector.shape_cast %29 : vector<8xf32> to vector<8x1xf32>
    %31 = vector.broadcast %3 : vector<1x1xf32> to vector<8x1xf32>
    %32 = arith.addf %30, %31 : vector<8x1xf32>
    %c0_20 = arith.constant 0 : index
    %c0_21 = arith.constant 0 : index
    %33 = vector.load %arg7[%c0_20, %c0_21] : memref<8x1xf32, #tpu.memory_space<vmem>>, vector<8x1xf32>
    tpu.vector_store %arg7[%c0_20, %c0_21], %32 {strides = array<i32>} : memref<8x1xf32, #tpu.memory_space<vmem>>, vector<8x1xf32>,
    return
  }
  func.func @transform_0(%arg0: i32) -> (i32, i32) {
    %c0_i32 = arith.constant 0 : i32
    %c0_i32_0 = arith.constant 0 : i32
    return %arg0, %c0_i32 : i32, i32
  }
  func.func @transform_1(%arg0: i32) -> (i32, i32) {
    %c0_i32 = arith.constant 0 : i32
    %c0_i32_0 = arith.constant 0 : i32
    %c0_i32_1 = arith.constant 0 : i32
    return %c0_i32, %c0_i32_0 : i32, i32
  }
  func.func @transform_2(%arg0: i32) -> (i32, i32) {
    %c0_i32 = arith.constant 0 : i32
    %c0_i32_0 = arith.constant 0 : i32
    %c0_i32_1 = arith.constant 0 : i32
    return %c0_i32, %c0_i32_0 : i32, i32
  }
  func.func @transform_3(%arg0: i32) -> (i32, i32) {
    %c0_i32 = arith.constant 0 : i32
    %c0_i32_0 = arith.constant 0 : i32
    %c0_i32_1 = arith.constant 0 : i32
    return %c0_i32, %c0_i32_0 : i32, i32
  }
  func.func @transform_4(%arg0: i32) -> (i32, i32) {
    %c0_i32 = arith.constant 0 : i32
    %c0_i32_0 = arith.constant 0 : i32
    %c0_i32_1 = arith.constant 0 : i32
    return %c0_i32, %c0_i32_0 : i32, i32
  }
  func.func @transform_5(%arg0: i32) -> (i32, i32) {
    %c0_i32 = arith.constant 0 : i32
    %c0_i32_0 = arith.constant 0 : i32
    %c0_i32_1 = arith.constant 0 : i32
    return %c0_i32, %c0_i32_0 : i32, i32
  }
  func.func @transform_6(%arg0: i32) -> (i32, i32) {
    %c0_i32 = arith.constant 0 : i32
    %c0_i32_0 = arith.constant 0 : i32
    return %arg0, %c0_i32 : i32, i32
  }
}

</mosaic_0001>

<bundles_post_ra>
// kernel: tpu_custom_call.1
= control target key start
LH: loop header
LB: loop body
LE: loop exit
PB: predicated region body
PF: predicated region fallthrough
CT: control target
= control target key end

     0   :  { %11 = vsyncpa [#allocation3], 0  ;;  %s752_s0 = inlined_call_operand.hbm [shape: f32[8,19], index: 0, kind: input, shape index: {}]   ;;  %s753_s1 = inlined_call_operand.hbm [shape: bf16[19,128], index: 1, kind: input, shape index: {}]   ;;  %s754_s2 = inlined_call_operand.hbm [shape: bf16[128,128], index: 2, kind: input, shape index: {}]   ;;  %s755_s3 = inlined_call_operand.hbm [shape: bf16[128,128], index: 3, kind: input, shape index: {}]   ;;  %s756_s4 = inlined_call_operand.vmem [shape: f32[1,128], index: 4, kind: input, shape index: {}]   ;;  %s757_s5 = inlined_call_operand.vmem [shape: f32[4,128], index: 5, kind: input, shape index: {}]   ;;  %s758_s6 = inlined_call_operand.vmem [shape: f32[8,1], index: 6, kind: output, shape index: {}]  }
   0x1   :  { %12 = vsyncpa [#allocation5], 0 }
   0x2   :  { %13 = vsyncpa [#allocation8], 0  ;;  %s609_s21 = smov [#allocation4]   ;;  %s515_s25 = scalar_lea.hbm %s753_s1, 192 }
   0x3   :  { %s29_s22 = sshll.u32 %s609_s21, 4  ;;  %p516_p0 = scmp.ne.s32.totalorder %s753_s1, %s515_s25  ;;  %s30_s22 = int_to_ptr.vmem [resolvable:$true] %s29_s22 }
   0x4   :  { %p519_p1 = scmp.lt.u32.totalorder %s515_s25, %s753_s1 }
   0x6   :  { %p521_p2 = pnand %p519_p1, %p516_p0 }
   0x8   :  { %524 = shalt.err (!%p521_p2)
}
   0x9   :  { %s525_s30 = scalar_lea.vmem %s30_s22, 192  ;;  %p530_p4 = scmp.lt.s32.totalorder %s30_s22, %s30_s22 }
   0xa   :  { %p526_p3 = scmp.ne.s32.totalorder %s30_s22, %s525_s30  ;;  %p531_p5 = scmp.lt.s32.totalorder %s525_s30, %s525_s30 }
   0xc   :  { %p532_p6 = por %p531_p5, %p530_p4 }
   0xe   :  { %p533_p7 = pnand %p532_p6, %p526_p3 }
  0x10   :  { %536 = shalt.err (!%p533_p7)
}
  0x11   :  { %s610_s7 = smov 64   ;;  %s611_s8 = smov 4  }
  0x12   :  { %35 = dma.hbm_to_vmem [thread:$0]  %s753_s1, 192, %s30_s22, [#allocation5], %s610_s7, %s610_s7, %s611_s8  }
  0x13   :  { %s612_s11 = smov [#allocation2]   ;;  %s613_s13 = smov [#allocation6]  }
  0x14   :  { %s20_s12 = sshll.u32 %s612_s11, 4  ;;  %s41_s14 = sshll.u32 %s613_s13, 4  ;;  %s21_s12 = int_to_ptr.vmem [resolvable:$true] %s20_s12  ;;  %s42_s14 = int_to_ptr.vmem [resolvable:$true] %s41_s14 }
  0x15   :  { %s537_s17 = scalar_lea.hbm %s752_s0, 128 }
  0x16   :  { %p538_p8 = scmp.ne.s32.totalorder %s752_s0, %s537_s17  ;;  %p541_p9 = scmp.lt.u32.totalorder %s537_s17, %s752_s0 }
  0x18   :  { %p543_p10 = pnand %p541_p9, %p538_p8 }
  0x1a   :  { %546 = shalt.err (!%p543_p10)
}
  0x1b   :  { %s547_s1 = scalar_lea.vmem %s21_s12, 128  ;;  %p552_p12 = scmp.lt.s32.totalorder %s21_s12, %s21_s12 }
  0x1c   :  { %p548_p11 = scmp.ne.s32.totalorder %s21_s12, %s547_s1  ;;  %p553_p13 = scmp.lt.s32.totalorder %s547_s1, %s547_s1 }
  0x1e   :  { %p554_p0 = por %p553_p13, %p552_p12 }
  0x20   :  { %p555_p1 = pnand %p554_p0, %p548_p11 }
  0x22   :  { %558 = shalt.err (!%p555_p1)
}
  0x23   :  { %23 = dma.hbm_to_vmem [thread:$0]  %s752_s0, 128, %s21_s12, [#allocation3]  }
  0x24   :  { %s559_s26 = scalar_lea.hbm %s754_s2, 1024 }
  0x25   :  { %p560_p2 = scmp.ne.s32.totalorder %s754_s2, %s559_s26  ;;  %p563_p3 = scmp.lt.u32.totalorder %s559_s26, %s754_s2 }
  0x27   :  { %p565_p4 = pnand %p563_p3, %p560_p2 }
  0x29   :  { %568 = shalt.err (!%p565_p4)
}
  0x2a   :  { %s569_s9 = scalar_lea.vmem %s42_s14, 1024  ;;  %p574_p6 = scmp.lt.s32.totalorder %s42_s14, %s42_s14 }
  0x2b   :  { %p570_p5 = scmp.ne.s32.totalorder %s42_s14, %s569_s9  ;;  %p575_p7 = scmp.lt.s32.totalorder %s569_s9, %s569_s9 }
  0x2d   :  { %p576_p8 = por %p575_p7, %p574_p6 }
  0x2f   :  { %p577_p9 = pnand %p576_p8, %p570_p5 }
  0x31   :  { %580 = shalt.err (!%p577_p9)
}
  0x32   :  { %47 = dma.hbm_to_vmem [thread:$0]  %s754_s2, 1024, %s42_s14, [#allocation5], %s610_s7, %s610_s7, %s611_s8  }
  0x33   :  { %s614_s11 = smov [#allocation7]   ;;  %s581_s16 = scalar_lea.hbm %s755_s3, 1024 }
  0x34   :  { %s53_s12 = sshll.u32 %s614_s11, 4  ;;  %p582_p10 = scmp.ne.s32.totalorder %s755_s3, %s581_s16  ;;  %s54_s12 = int_to_ptr.vmem [resolvable:$true] %s53_s12 }
  0x35   :  { %p585_p11 = scmp.lt.u32.totalorder %s581_s16, %s755_s3 }
  0x37   :  { %p587_p12 = pnand %p585_p11, %p582_p10 }
  0x39   :  { %590 = shalt.err (!%p587_p12)
}
  0x3a   :  { %s591_s21 = scalar_lea.vmem %s54_s12, 1024  ;;  %p596_p0 = scmp.lt.s32.totalorder %s54_s12, %s54_s12 }
  0x3b   :  { %p592_p13 = scmp.ne.s32.totalorder %s54_s12, %s591_s21  ;;  %p597_p1 = scmp.lt.s32.totalorder %s591_s21, %s591_s21 }
  0x3d   :  { %p598_p2 = por %p597_p1, %p596_p0 }
  0x3f   :  { %p599_p3 = pnand %p598_p2, %p592_p13 }
  0x41   :  { %602 = shalt.err (!%p599_p3)
}
  0x42   :  { %59 = dma.hbm_to_vmem [thread:$0]  %s755_s3, 1024, %s54_s12, [#allocation8], %s610_s7, %s610_s7, %s611_s8  }
  0x43   :  { %603 = dma.done.wait [#allocation3], 128  }
  0x44   :  { %604 = vsyncadd [#allocation3], 4294967168 }
  0x45   :  { %605 = dma.done.wait [#allocation5], 1216  }
  0x46   :  { %606 = vsyncadd [#allocation5], 4294966080 }
  0x47   :  { %607 = dma.done.wait [#allocation8], 1024  }
  0x48   :  { %608 = vsyncadd [#allocation8], 4294966272  ;;  %v615_v0 = vmov 0.0   ;;  %vm103_vm0 = vcmask 1040384   ;;  %vm616_vm1 = vmmov 0   ;;  %vm104_vm2 = vcmask 1041408  }
  0x49   :  { %440 = vmatprep.subr.bf16.mxu0 %v615_v0  ;;  %448 = vmatprep.subr.bf16.mxu1 %v615_v0  ;;  %v617_v1 = vmov 65535   ;;  %v497_v3 = vld [vmem:[#allocation4] sm:$0xff]   ;;  %v498_v5 = vld [vmem:[#allocation4 + $0x8] ss:$0 sps:$4 sm:$0x33]   ;;  %v81_v6 = vld [vmem:[#allocation2] sm:$0xff] }
  0x4a   :  { %444 = vmatprep.mubr.msk.bf16.mxu0 %vm616_vm1, %v615_v0  ;;  %464 = vmatprep.mubr.msk.bf16.mxu1 %vm616_vm1, %v615_v0  ;;  %v105_v2 = vsel %vm103_vm0, 4294967295, %v617_v1  ;;  %v499_v7 = vld [vmem:[#allocation6] sm:$0xff]   ;;  %v500_v9 = vld [vmem:[#allocation6 + $0x8] sm:$0xff]   ;;  %v82_v10 = vpack.c.bf16 %v81_v6, %v81_v6  ;;  %vm99_vm3 = vcmask 154624   ;;  %v501_v11 = vld [vmem:[#allocation6 + $0x10] sm:$0xff]   ;;  %vm386_vm4 = vcmask 7168  }
  0x4b   :  { %v106_v4 = vsel %vm104_vm2, %v105_v2, 0  ;;  %441 = vmatpush3.bf16.msra.mxu0 %v497_v3  ;;  %449 = vmatpush3.bf16.msra.mxu1 %v499_v7  ;;  %v502_v12 = vld [vmem:[#allocation6 + $0x18] sm:$0xff]   ;;  %v503_v13 = vld [vmem:[#allocation6 + $0x20] sm:$0xff]   ;;  %v504_v14 = vld [vmem:[#allocation6 + $0x28] sm:$0xff]  }
  0x4c   :  { %442 = vmatprep.subr.bf16.mxu0 %v615_v0  ;;  %v108_v8 = vand.u32 %v498_v5, %v106_v4  ;;  %450 = vmatprep.subr.bf16.mxu1 %v615_v0  ;;  %v505_v15 = vld [vmem:[#allocation6 + $0x30] sm:$0xff]   ;;  %v506_v16 = vld [vmem:[#allocation6 + $0x38] sm:$0xff]   ;;  %v507_v17 = vld [vmem:[#allocation7] sm:$0xff]  }
  0x4d   :  { %v508_v18 = vld [vmem:[#allocation7 + $0x8] sm:$0xff]   ;;  %v509_v19 = vld [vmem:[#allocation7 + $0x10] sm:$0xff]   ;;  %v510_v20 = vld [vmem:[#allocation7 + $0x18] sm:$0xff]  }
  0x4e   :  { %v511_v21 = vld [vmem:[#allocation7 + $0x20] sm:$0xff]   ;;  %v512_v22 = vld [vmem:[#allocation7 + $0x28] sm:$0xff]   ;;  %v513_v31 = vld [vmem:[#allocation7 + $0x30] sm:$0xff]  }
  0x4f   :  { %443 = vmatpush3.bf16.msra.mxu0 %v108_v8  ;;  %451 = vmatpush3.bf16.msra.mxu1 %v500_v9  ;;  %v395_v23 = vld [vmem:[%s757_s5] ss:$0 sm:$0xff]  ;;  %v514_v32 = vld [vmem:[#allocation7 + $0x38] sm:$0xff]   ;;  %v399_v33 = vld [vmem:[%s757_s5 + $0x1] ss:$0 sm:$0xff] }
  0x50   :  { %468 = vmatprep.subr.bf16.mxu0 %v615_v0  ;;  %452 = vmatprep.subr.bf16.mxu1 %v615_v0  ;;  %v408_v41 = vld [vmem:[%s757_s5 + $0x2] ss:$0 sm:$0xff]  ;;  %v417_v46 = vld [vmem:[%s756_s4] ss:$0 sm:$0xff]  ;;  %v418_v50 = vld [vmem:[%s757_s5 + $0x3] ss:$0 sm:$0xff] }
  0x52   :  { %445 = vmatmul.mubr.msk.bf16.vlgmr.msra.gmra.mrb[0].mxu0 %vm99_vm3, %v82_v10 }
  0x53   :  { %484 = vmatprep.mubr.msk.bf16.mxu0 %vm616_vm1, %v615_v0  ;;  %453 = vmatpush3.bf16.msra.mxu1 %v501_v11 }
  0x54   :  { %454 = vmatprep.subr.bf16.mxu1 %v615_v0  ;;  %469 = vmatpush3.bf16.msra.mxu0 %v507_v17 }
  0x55   :  { %470 = vmatprep.subr.bf16.mxu0 %v615_v0 }
  0x57   :  { %455 = vmatpush3.bf16.msra.mxu1 %v502_v12 }
  0x58   :  { %456 = vmatprep.subr.bf16.mxu1 %v615_v0  ;;  %471 = vmatpush3.bf16.msra.mxu0 %v508_v18 }
  0x59   :  { %472 = vmatprep.subr.bf16.mxu0 %v615_v0 }
  0x5b   :  { %457 = vmatpush3.bf16.msra.mxu1 %v503_v13 }
  0x5c   :  { %458 = vmatprep.subr.bf16.mxu1 %v615_v0  ;;  %473 = vmatpush3.bf16.msra.mxu0 %v509_v19 }
  0x5d   :  { %474 = vmatprep.subr.bf16.mxu0 %v615_v0 }
  0x5f   :  { %459 = vmatpush3.bf16.msra.mxu1 %v504_v14 }
  0x60   :  { %460 = vmatprep.subr.bf16.mxu1 %v615_v0  ;;  %475 = vmatpush3.bf16.msra.mxu0 %v510_v20 }
  0x61   :  { %476 = vmatprep.subr.bf16.mxu0 %v615_v0 }
  0x63   :  { %461 = vmatpush3.bf16.msra.mxu1 %v505_v15 }
  0x64   :  { %462 = vmatprep.subr.bf16.mxu1 %v615_v0  ;;  %477 = vmatpush3.bf16.msra.mxu0 %v511_v21 }
  0x65   :  { %478 = vmatprep.subr.bf16.mxu0 %v615_v0 }
  0x67   :  { %463 = vmatpush3.bf16.msra.mxu1 %v506_v16 }
  0x68   :  { %479 = vmatpush3.bf16.msra.mxu0 %v512_v22 }
  0x69   :  { %480 = vmatprep.subr.bf16.mxu0 %v615_v0 }
  0x6c   :  { %481 = vmatpush3.bf16.msra.mxu0 %v513_v31 }
  0x6d   :  { %482 = vmatprep.subr.bf16.mxu0 %v615_v0 }
  0x70   :  { %483 = vmatpush3.bf16.msra.mxu0 %v514_v32 }
 0x125   :  { %v144_v24 = vpop.f32.mrb[0].mxu0 }
 0x126   :  { %v145_v25 = vadd.f32 %v395_v23, %v144_v24  ;;  %v446_v26 = vpop.f32.mrb[1].mxu0 }
 0x127   :  { %v147_v27 = vpop.f32.mrb[2].mxu0 }
 0x128   :  { %v150_v28 = vmax.f32 %v145_v25, 0.0  ;;  %v447_v29 = vpop.f32.mrb[3].mxu0 }
 0x12a   :  { %v151_v30 = vpack.c.bf16 %v150_v28, %v150_v28 }
 0x12c   :  { %465 = vmatmul.mubr.bf16.vlgmr.msra.gmra.mrb[0].mxu1 %v151_v30 }
 0x1ff   :  { %v254_v34 = vpop.f32.mrb[0].mxu1 }
 0x200   :  { %v255_v35 = vadd.f32 %v399_v33, %v254_v34  ;;  %v466_v36 = vpop.f32.mrb[1].mxu1 }
 0x201   :  { %v257_v37 = vpop.f32.mrb[2].mxu1 }
 0x202   :  { %v260_v38 = vmax.f32 %v255_v35, 0.0  ;;  %v467_v39 = vpop.f32.mrb[3].mxu1 }
 0x204   :  { %v261_v40 = vpack.c.bf16 %v260_v38, %v260_v38 }
 0x206   :  { %485 = vmatmul.mubr.bf16.vlgmr.msra.gmra.mrb[4].mxu0 %v261_v40 }
 0x2d9   :  { %v364_v42 = vpop.f32.mrb[4].mxu0 }
 0x2da   :  { %v365_v43 = vadd.f32 %v408_v41, %v364_v42  ;;  %v486_v44 = vpop.f32.mrb[5].mxu0 }
 0x2db   :  { %v367_v45 = vpop.f32.mrb[6].mxu0 }
 0x2dc   :  { %v370_v47 = vmax.f32 %v365_v43, 0.0  ;;  %v487_v48 = vpop.f32.mrb[7].mxu0 }
 0x2de   :  { %v378_v49 = vmul.f32 %v417_v46, %v370_v47 }
 0x2e0   :  { %379 = vadd.xlane.f32.xlu0 %v378_v49 }
 0x36d   :  { %v380_v51 = vpop.xlane.xlu0 %379 }
 0x36e   :  { %v385_v52 = vadd.f32 %v418_v50, %v380_v51 }
 0x370   :  { %387 = vst.msk [vmem:[%s758_s6] sm:$0xff] %vm386_vm4, %v385_v52 }
 0x371   :  { %392 = vsyncpa [#allocation3], 1 }
 0x372   :  { %393 = vsyncpa [#allocation5], 1 }
 0x373   :  { %394 = vsyncpa [#allocation8], 1 }

</bundles_post_ra>
